<compile_context>
chip_gen: v6e
topology: v6e:2x2x1
jax: 0.10.0
libtpu: 0.0.40
codegen_flags: <defaults>
</compile_context>

<pallas_src>
import functools
import math

import jax
import jax.numpy as jnp
from jax import lax
from jax.experimental import pallas as pl
from jax.experimental.pallas import tpu as pltpu


def _arcmargin_kernel(x_ref, w_ref, label_ref, out_ref, *, cos_m, sin_m, s, tc):
    j = pl.program_id(1)          # C-tile index

    x = x_ref[...]                # (TB, D)  float32
    w_n = w_ref[...]              # (TC, D)  float32, rows already L2-normalized
    label = label_ref[...]        # (TB, 1)  int32

    # --- normalize x rows: x * rsqrt(max(sum_sq, eps^2))  (== x / max(||x||, eps)) ---
    sum_sq = jnp.sum(x * x, axis=-1, keepdims=True)
    x_n = x * lax.rsqrt(jnp.maximum(sum_sq, jnp.float32(1e-24)))

    # --- cosine = x_n @ w_n.T, contracting D on both operands (no transpose) ---
    # TODO(synk): optionally cast x_n / w_n to bf16 here (keep f32 accumulation)
    # for ~2-4x MXU throughput if ~1e-3 cosine error is acceptable downstream.
    cosine = lax.dot_general(
        x_n, w_n,
        dimension_numbers=(((1,), (1,)), ((), ())),
        preferred_element_type=jnp.float32,
    )                              # (TB, TC)

    # --- one-hot for this C tile: global column id == label ---
    col = lax.broadcasted_iota(jnp.int32, cosine.shape, 1) + j * tc
    one_hot = (col == label).astype(jnp.float32)            # (TB, TC)

    # --- ArcFace margin only at the label column (TB sqrts, not TB*TC) ---
    cos_lab = jnp.sum(one_hot * cosine, axis=-1, keepdims=True)   # (TB, 1); 0 if label not in tile
    sin_lab = jnp.sqrt(jnp.maximum(1.0 - cos_lab * cos_lab, 0.0))
    phi = cos_lab * cos_m - sin_lab * sin_m
    phi = jnp.where(cos_lab > 0.0, phi, cos_lab)             # easy-margin branch (matches spec)

    out = (cosine + one_hot * (phi - cos_lab)) * s
    out_ref[...] = out.astype(out_ref.dtype)


def _pick_tile(n, candidates):
    """Largest candidate that evenly divides n, else the full extent."""
    for t in candidates:
        if n % t == 0:
            return t
    return n


def arc_margin_product(x, weight, label, *, s=30.0, m=0.5):
    """ArcMarginProduct forward.

    x:      (B, in_features)  float32
    weight: (out_features, in_features) float32
    label:  (B,) int class indices
    returns (B, out_features) float32
    """
    B, D = x.shape
    C, D2 = weight.shape
    assert D == D2
    label2d = label.astype(jnp.int32).reshape(B, 1)

    # Hoisted: pre-normalize weight rows once (otherwise recomputed per B tile).
    w_sq = jnp.sum(weight * weight, axis=-1, keepdims=True)
    w_n = weight * lax.rsqrt(jnp.maximum(w_sq, jnp.float32(1e-24)))

    # Tile sizes: lane-dense output (TC multiple of 128), TB multiple of 8.
    # Sized so double-buffered weight tiles + (TB, TC) temps stay well under
    # v7x's 64 MiB VMEM for typical D.
    tb = _pick_tile(B, (256, 128, 64, 32, 16, 8))
    tc = _pick_tile(C, (1024, 512, 256, 128))

    cos_m = float(math.cos(m))
    sin_m = float(math.sin(m))
    kernel = functools.partial(
        _arcmargin_kernel, cos_m=cos_m, sin_m=sin_m, s=float(s), tc=tc
    )

    grid = (B // tb, C // tc)
    return pl.pallas_call(
        kernel,
        out_shape=jax.ShapeDtypeStruct((B, C), jnp.float32),
        grid=grid,
        in_specs=[
            pl.BlockSpec((tb, D), lambda i, j: (i, 0)),   # x: B-tiled, full D
            pl.BlockSpec((tc, D), lambda i, j: (j, 0)),   # normalized W: C-tiled, full D
            pl.BlockSpec((tb, 1), lambda i, j: (i, 0)),   # labels: B-tiled
        ],
        out_specs=pl.BlockSpec((tb, tc), lambda i, j: (i, j)),
        compiler_params=pltpu.CompilerParams(
            dimension_semantics=("parallel", "parallel"),  # no reduction axis in the grid
            vmem_limit_bytes=32 * 1024 * 1024,             # safe on v5e/v6e/v7x
        ),
    )(x, w_n, label2d)


def _reference(x, weight, label, s=30.0, m=0.5):
    eps = 1e-12
    x_n = x / jnp.maximum(jnp.linalg.norm(x, axis=1, keepdims=True), eps)
    w_n = weight / jnp.maximum(jnp.linalg.norm(weight, axis=1, keepdims=True), eps)
    cosine = x_n @ w_n.T
    sine = jnp.sqrt(jnp.maximum(1.0 - cosine**2, 0.0))
    phi = cosine * jnp.cos(m) - sine * jnp.sin(m)
    phi = jnp.where(cosine > 0, phi, cosine)
    one_hot = jax.nn.one_hot(label, weight.shape[0], dtype=cosine.dtype)
    return (one_hot * phi + (1.0 - one_hot) * cosine) * s


def _run_case(key, B, D, C):
    kx, kw, kl = jax.random.split(key, 3)
    x = jax.random.normal(kx, (B, D), dtype=jnp.float32)
    bound = math.sqrt(6.0 / (C + D))  # deterministic xavier_uniform_-style init
    weight = jax.random.uniform(kw, (C, D), minval=-bound, maxval=bound, dtype=jnp.float32)
    label = jax.random.randint(kl, (B,), 0, C, dtype=jnp.int32)

    out = jax.block_until_ready(arc_margin_product(x, weight, label, s=30.0, m=0.5))
    ref = _reference(x, weight, label, s=30.0, m=0.5)
    assert out.shape == (B, C)
    assert jnp.allclose(out, ref, atol=1e-4, rtol=1e-4), f"mismatch at B={B} D={D} C={C}"


if __name__ == "__main__":
    key = jax.random.PRNGKey(0)
    k1, k2 = jax.random.split(key)

    # Toy shape consistent with the module: batch=8, in_features=32, out_features=128
    _run_case(k1, B=8, D=32, C=128)

    # Small multi-tile case to exercise the (B-tile, C-tile) grid (3 x 3 tiles).
    _run_case(k2, B=24, D=32, C=384)

    print("KERNEL_OK")
</pallas_src>

<mosaic_0001>
module attributes {stable_mosaic.version = 11 : i64} {
  func.func @_arcmargin_kernel(%arg0: i32, %arg1: i32, %arg2: memref<8x32xf32, #tpu.memory_space<vmem>>, %arg3: memref<128x32xf32, #tpu.memory_space<vmem>>, %arg4: memref<8x1xi32, #tpu.memory_space<vmem>>, %arg5: memref<8x128xf32, #tpu.memory_space<vmem>>) attributes {dimension_semantics = [#tpu.dimension_semantics<parallel>, #tpu.dimension_semantics<parallel>], iteration_bounds = array<i64: 1, 1>, scalar_prefetch = 0 : i64, scratch_operands = 0 : i64, tpu.core_type = #tpu.core_type<tc>, window_params = [{transform_indices = @transform_0, window_bounds = array<i64: 8, 32>}, {transform_indices = @transform_1, window_bounds = array<i64: 128, 32>}, {transform_indices = @transform_2, window_bounds = array<i64: 8, 1>}, {transform_indices = @transform_3, window_bounds = array<i64: 8, 128>}]} {
    %c0 = arith.constant 0 : index
    %c0_0 = arith.constant 0 : index
    %0 = vector.load %arg2[%c0, %c0_0] : memref<8x32xf32, #tpu.memory_space<vmem>>, vector<8x32xf32>
    %c0_1 = arith.constant 0 : index
    %c0_2 = arith.constant 0 : index
    %1 = vector.load %arg3[%c0_1, %c0_2] : memref<128x32xf32, #tpu.memory_space<vmem>>, vector<128x32xf32>
    %c0_3 = arith.constant 0 : index
    %c0_4 = arith.constant 0 : index
    %2 = vector.load %arg4[%c0_3, %c0_4] : memref<8x1xi32, #tpu.memory_space<vmem>>, vector<8x1xi32>
    %3 = arith.mulf %0, %0 : vector<8x32xf32>
    %cst = arith.constant dense<0.000000e+00> : vector<8xf32>
    %4 = vector.multi_reduction <add>, %3, %cst [1] : vector<8x32xf32> to vector<8xf32>
    %5 = vector.shape_cast %4 : vector<8xf32> to vector<8x1xf32>
    %cst_5 = arith.constant 1.000000e-24 : f32
    %6 = vector.broadcast %cst_5 : f32 to vector<8x1xf32>
    %7 = arith.maximumf %5, %6 : vector<8x1xf32>
    %8 = math.rsqrt %7 : vector<8x1xf32>
    %9 = vector.broadcast %8 : vector<8x1xf32> to vector<8x32xf32>
    %10 = arith.mulf %0, %9 : vector<8x32xf32>
    %cst_6 = arith.constant dense<0.000000e+00> : vector<8x128xf32>
    %11 = tpu.matmul %10, %1, %cst_6 {dimension_numbers = #tpu.dot_dimension_numbers<[1], [1], [0], [0], [0, 0, 1, 0], [], []>} : vector<8x32xf32>, vector<128x32xf32>, vector<8x128xf32> -> vector<8x128xf32>
    %12 = tpu.iota {dimensions = array<i32: 1>} : vector<8x128xi32>
    %c128_i32 = arith.constant 128 : i32
    %13 = arith.muli %arg1, %c128_i32 : i32
    %14 = vector.broadcast %13 : i32 to vector<8x128xi32>
    %15 = arith.addi %12, %14 : vector<8x128xi32>
    %16 = vector.broadcast %2 : vector<8x1xi32> to vector<8x128xi32>
    %17 = arith.cmpi eq, %15, %16 : vector<8x128xi32>
    %18 = arith.extui %17 : vector<8x128xi1> to vector<8x128xi32>
    %19 = arith.sitofp %18 : vector<8x128xi32> to vector<8x128xf32>
    %20 = arith.mulf %19, %11 : vector<8x128xf32>
    %cst_7 = arith.constant dense<0.000000e+00> : vector<8xf32>
    %21 = vector.multi_reduction <add>, %20, %cst_7 [1] : vector<8x128xf32> to vector<8xf32>
    %22 = vector.shape_cast %21 : vector<8xf32> to vector<8x1xf32>
    %23 = arith.mulf %22, %22 : vector<8x1xf32>
    %cst_8 = arith.constant 1.000000e+00 : f32
    %24 = vector.broadcast %cst_8 : f32 to vector<8x1xf32>
    %25 = arith.subf %24, %23 : vector<8x1xf32>
    %cst_9 = arith.constant 0.000000e+00 : f32
    %26 = vector.broadcast %cst_9 : f32 to vector<8x1xf32>
    %27 = arith.maximumf %25, %26 : vector<8x1xf32>
    %28 = math.sqrt %27 : vector<8x1xf32>
    %cst_10 = arith.constant 0.87758255 : f32
    %29 = vector.broadcast %cst_10 : f32 to vector<8x1xf32>
    %30 = arith.mulf %22, %29 : vector<8x1xf32>
    %cst_11 = arith.constant 0.47942555 : f32
    %31 = vector.broadcast %cst_11 : f32 to vector<8x1xf32>
    %32 = arith.mulf %28, %31 : vector<8x1xf32>
    %33 = arith.subf %30, %32 : vector<8x1xf32>
    %cst_12 = arith.constant 0.000000e+00 : f32
    %34 = vector.broadcast %cst_12 : f32 to vector<8x1xf32>
    %35 = arith.cmpf ogt, %22, %34 : vector<8x1xf32>
    %36 = arith.select %35, %33, %22 : vector<8x1xi1>, vector<8x1xf32>
    %37 = arith.subf %36, %22 : vector<8x1xf32>
    %38 = vector.broadcast %37 : vector<8x1xf32> to vector<8x128xf32>
    %39 = arith.mulf %19, %38 : vector<8x128xf32>
    %40 = arith.addf %11, %39 : vector<8x128xf32>
    %cst_13 = arith.constant 3.000000e+01 : f32
    %41 = vector.broadcast %cst_13 : f32 to vector<8x128xf32>
    %42 = arith.mulf %40, %41 : vector<8x128xf32>
    %c0_14 = arith.constant 0 : index
    %c0_15 = arith.constant 0 : index
    %43 = vector.load %arg5[%c0_14, %c0_15] : memref<8x128xf32, #tpu.memory_space<vmem>>, vector<8x128xf32>
    tpu.vector_store %arg5[%c0_14, %c0_15], %42 {strides = array<i32>} : memref<8x128xf32, #tpu.memory_space<vmem>>, vector<8x128xf32>,
    return
  }
  func.func @transform_0(%arg0: i32, %arg1: i32) -> (i32, i32) {
    %c0_i32 = arith.constant 0 : i32
    %c0_i32_0 = arith.constant 0 : i32
    return %arg0, %c0_i32 : i32, i32
  }
  func.func @transform_1(%arg0: i32, %arg1: i32) -> (i32, i32) {
    %c0_i32 = arith.constant 0 : i32
    %c0_i32_0 = arith.constant 0 : i32
    return %arg1, %c0_i32 : i32, i32
  }
  func.func @transform_2(%arg0: i32, %arg1: i32) -> (i32, i32) {
    %c0_i32 = arith.constant 0 : i32
    %c0_i32_0 = arith.constant 0 : i32
    return %arg0, %c0_i32 : i32, i32
  }
  func.func @transform_3(%arg0: i32, %arg1: i32) -> (i32, i32) {
    %c0_i32 = arith.constant 0 : i32
    return %arg0, %arg1 : i32, i32
  }
}

</mosaic_0001>

<bundles_post_ra>
// kernel: tpu_custom_call.1
= control target key start
LH: loop header
LB: loop body
LE: loop exit
PB: predicated region body
PF: predicated region fallthrough
CT: control target
= control target key end

     0   :  { %vm34_vm0 = vcmask 261120   ;;  %v311_v3 = vmov 0.0   ;;  %s433_s0 = inlined_call_operand.vmem [shape: f32[8,32], index: 0, kind: input, shape index: {}]   ;;  %s434_s1 = inlined_call_operand.vmem [shape: f32[128,32], index: 1, kind: input, shape index: {}]   ;;  %s435_s2 = inlined_call_operand.vmem [shape: s32[8,1], index: 2, kind: input, shape index: {}]   ;;  %s436_s3 = inlined_call_operand.hbm [shape: f32[8,128], index: 3, kind: output, shape index: {}]  }
   0x1   :  { %v338_v0 = vld [vmem:[%s433_s0] sm:$0xff]  ;;  %v31_v1 = vld [vmem:[%s434_s1 + $0x78] sm:$0xff]  ;;  %245 = vmatprep.subr.mxu0 %v311_v3  ;;  %v30_v5 = vld [vmem:[%s434_s1 + $0x70] sm:$0xff] }
   0x2   :  { %v33_v2 = vmul.f32 %v338_v0, %v338_v0  ;;  %246 = vmatpush3.xpose.msk.msra.mxu0 %vm34_vm0, %v31_v1 }
   0x3   :  { %247 = vmatprep.subr.mxu0 %v311_v3 }
   0x4   :  { %v35_v4 = vsel %vm34_vm0, %v33_v2, 0.0 }
   0x5   :  { %36 = vadd.xlane.f32.xlu0 %v35_v4 }
   0x6   :  { %8 = vsyncpa [#allocation3], 0  ;;  %248 = vmatpush3.xpose.msk.msra.mxu0 %vm34_vm0, %v30_v5  ;;  %v29_v6 = vld [vmem:[%s434_s1 + $0x68] sm:$0xff]  ;;  %v28_v7 = vld [vmem:[%s434_s1 + $0x60] sm:$0xff]  ;;  %vm312_vm1 = vmmov 0   ;;  %v313_v14 = vmov 0   ;;  %v162_v26 = vlaneseq }
   0x7   :  { %249 = vmatprep.subr.mxu0 %v311_v3  ;;  %v27_v8 = vld [vmem:[%s434_s1 + $0x58] sm:$0xff]  ;;  %277 = vmatprep.mubr.msk.f32.mxu0 %vm312_vm1, %v311_v3  ;;  %v26_v9 = vld [vmem:[%s434_s1 + $0x50] sm:$0xff]  ;;  %v25_v10 = vld [vmem:[%s434_s1 + $0x48] sm:$0xff] }
   0x8   :  { %v24_v11 = vld [vmem:[%s434_s1 + $0x40] sm:$0xff]  ;;  %v23_v12 = vld [vmem:[%s434_s1 + $0x38] sm:$0xff]  ;;  %284 = vset.pattern.permute.xlu0 %v313_v14  ;;  %v22_v15 = vld [vmem:[%s434_s1 + $0x30] sm:$0xff]  ;;  %v163_v27 = vand.u32 127, %v162_v26 }
   0x9   :  { %v32_v13 = vld [vmem:[%s435_s2] sm:$0xff]  ;;  %v21_v16 = vld [vmem:[%s434_s1 + $0x28] sm:$0xff]  ;;  %v19_v18 = vld [vmem:[%s434_s1 + $0x18] sm:$0xff] }
   0xa   :  { %250 = vmatpush3.xpose.msk.msra.mxu0 %vm34_vm0, %v29_v6  ;;  %v20_v17 = vld [vmem:[%s434_s1 + $0x20] sm:$0xff]  ;;  %v18_v19 = vld [vmem:[%s434_s1 + $0x10] sm:$0xff]  ;;  %v17_v20 = vld [vmem:[%s434_s1 + $0x8] sm:$0xff] }
   0xb   :  { %251 = vmatprep.subr.mxu0 %v311_v3  ;;  %v16_v21 = vld [vmem:[%s434_s1] sm:$0xff]  ;;  %s314_s1 = smov [#allocation2]  }
   0xc   :  { %s202_s18 = sshll.u32 %s314_s1, 4  ;;  %s203_s18 = int_to_ptr.vmem [resolvable:$true] %s202_s18 }
   0xd   :  { %s289_s19 = scalar_lea.vmem %s203_s18, 128  ;;  %p294_p1 = scmp.lt.s32.totalorder %s203_s18, %s203_s18 }
   0xe   :  { %252 = vmatpush3.xpose.msk.msra.mxu0 %vm34_vm0, %v28_v7  ;;  %p290_p0 = scmp.ne.s32.totalorder %s203_s18, %s289_s19  ;;  %p295_p2 = scmp.lt.s32.totalorder %s289_s19, %s289_s19 }
   0xf   :  { %253 = vmatprep.subr.mxu0 %v311_v3 }
  0x10   :  { %p296_p3 = por %p295_p2, %p294_p1 }
  0x12   :  { %254 = vmatpush3.xpose.msk.msra.mxu0 %vm34_vm0, %v27_v8  ;;  %p297_p4 = pnand %p296_p3, %p290_p0 }
  0x13   :  { %255 = vmatprep.subr.mxu0 %v311_v3 }
  0x16   :  { %256 = vmatpush3.xpose.msk.msra.mxu0 %vm34_vm0, %v26_v9 }
  0x17   :  { %257 = vmatprep.subr.mxu0 %v311_v3 }
  0x1a   :  { %258 = vmatpush3.xpose.msk.msra.mxu0 %vm34_vm0, %v25_v10 }
  0x1b   :  { %259 = vmatprep.subr.mxu0 %v311_v3  ;;  %168 = vperm.xlu0 %284, %v32_v13  }
  0x1e   :  { %260 = vmatpush3.xpose.msk.msra.mxu0 %vm34_vm0, %v24_v11 }
  0x1f   :  { %261 = vmatprep.subr.mxu0 %v311_v3 }
  0x22   :  { %262 = vmatpush3.xpose.msk.msra.mxu0 %vm34_vm0, %v23_v12 }
  0x23   :  { %263 = vmatprep.subr.mxu0 %v311_v3 }
  0x26   :  { %264 = vmatpush3.xpose.msk.msra.mxu0 %vm34_vm0, %v22_v15 }
  0x27   :  { %265 = vmatprep.subr.mxu0 %v311_v3 }
  0x2a   :  { %266 = vmatpush3.xpose.msk.msra.mxu0 %vm34_vm0, %v21_v16 }
  0x2b   :  { %267 = vmatprep.subr.mxu0 %v311_v3 }
  0x2e   :  { %268 = vmatpush3.xpose.msk.msra.mxu0 %vm34_vm0, %v20_v17 }
  0x2f   :  { %269 = vmatprep.subr.mxu0 %v311_v3 }
  0x32   :  { %270 = vmatpush3.xpose.msk.msra.mxu0 %vm34_vm0, %v19_v18 }
  0x33   :  { %271 = vmatprep.subr.mxu0 %v311_v3 }
  0x36   :  { %272 = vmatpush3.xpose.msk.msra.mxu0 %vm34_vm0, %v18_v19 }
  0x37   :  { %273 = vmatprep.subr.mxu0 %v311_v3 }
  0x3a   :  { %274 = vmatpush3.xpose.msk.msra.mxu0 %vm34_vm0, %v17_v20 }
  0x3b   :  { %275 = vmatprep.subr.mxu0 %v311_v3 }
  0x3e   :  { %276 = vmatpush3.xpose.msk.msra.mxu0 %vm34_vm0, %v16_v21 }
  0x8e   :  { %v37_v22 = vpop.xlane.xlu0 %36 }
  0x8f   :  { %v38_v23 = vmax.f32 %v37_v22, 1e-24 }
  0x91   :  { %285 = vrsqrt.f32 %v38_v23 }
  0x96   :  { %v169_v28 = vpop.permute.xlu0 %168 }
  0x97   :  { %vm170_vm2 = vcmp.eq.s32.totalorder %v163_v27, %v169_v28 }
  0x98   :  { %v227_v29 = vsel %vm170_vm2, 1.0, %v311_v3 }
  0x9e   :  { %v286_v24 = vpop.eup %285 }
  0x9f   :  { %v40_v25 = vmul.f32 %v286_v24, %v338_v0 }
  0xa1   :  { %278 = vmatmul.mubr.msk.f32.vlgmr.msra.gmra.mxu0 %vm34_vm0, %v40_v25 }
 0x161   :  { %v158_v30 = vpop.f32.mrf.mxu0 }
 0x162   :  { %v173_v31 = vmul.f32 %v227_v29, %v158_v30 }
 0x163   :  { %v279_v32 = vpop.f32.mrf.mxu0 }
 0x164   :  { %174 = vadd.xlane.f32.xlu1 %v173_v31 }
 0x1ed   :  { %v175_v33 = vpop.xlane.xlu1 %174 }
 0x1ee   :  { %v176_v34 = vmul.f32 %v175_v33, %v175_v33  ;;  %v186_v42 = vmul.f32 0.87758255, %v175_v33  ;;  %vm189_vm5 = vcmp.gt.f32.partialorder %v175_v33, 0.0 }
 0x1f0   :  { %v177_v35 = vsub.f32 1.0, %v176_v34 }
 0x1f2   :  { %v178_v36 = vmax.f32 %v177_v35, 0.0 }
 0x1f4   :  { %287 = vrsqrt.f32 %v178_v36  ;;  %vm181_vm3 = vcmp.eq.f32.partialorder %v178_v36, inf  ;;  %v184_v39 = vand.u32 2147483648, %v178_v36  ;;  %vm183_vm4 = vcmp.eq.f32.partialorder %v178_v36, 0.0 }
 0x201   :  { %v288_v37 = vpop.eup %287 }
 0x202   :  { %v180_v38 = vmul.f32 %v288_v37, %v178_v36 }
 0x204   :  { %v182_v40 = vsel %vm181_vm3, %v178_v36, %v180_v38 }
 0x205   :  { %v185_v41 = vsel %vm183_vm4, %v184_v39, %v182_v40 }
 0x206   :  { %v187_v43 = vmul.f32 0.47942555, %v185_v41 }
 0x208   :  { %v188_v44 = vsub.f32 %v186_v42, %v187_v43 }
 0x20a   :  { %v190_v45 = vsel %vm189_vm5, %v188_v44, %v175_v33 }
 0x20b   :  { %v191_v46 = vsub.f32 %v190_v45, %v175_v33 }
 0x20d   :  { %v192_v47 = vmul.f32 %v227_v29, %v191_v46 }
 0x20f   :  { %v193_v48 = vadd.f32 %v192_v47, %v158_v30 }
 0x211   :  { %v194_v49 = vmul.f32 30.0, %v193_v48 }
 0x213   :  { %195 = vst [vmem:[#allocation2] sm:$0xff] %v194_v49 }
 0x214   :  { %300 = shalt.err (!%p297_p4)
}
 0x215   :  { %205 = dma.vmem_to_hbm [thread:$0]  %s203_s18, 128, %s436_s3, [#allocation3]  }
 0x216   :  { %309 = dma.done.wait [#allocation3], 128  }
 0x217   :  { %310 = vsyncadd [#allocation3], 4294967168 }
 0x218   :  { %209 = vsyncpa [#allocation3], 1 }

</bundles_post_ra>
